<compile_context>
chip_gen: v7x
topology: tpu7x:2x2x1
jax: 0.10.0
libtpu: 0.0.40
codegen_flags: <defaults>
</compile_context>

<pallas_src>
import functools

import jax
import jax.numpy as jnp
from jax.experimental import pallas as pl
from jax.experimental.pallas import tpu as pltpu

_VMEM_LIMIT = 64 * 1024 * 1024


# ----------------------------------------------------------------------------
# Kernel 1: "stem" — C3.cv1 and C3.cv2 (both 1x1 conv + BN + SiLU) as a single
# matmul over row tiles of the flattened (N*H*W, Cin) activation.
# ----------------------------------------------------------------------------
def _stem_kernel(x_ref, w12_ref, s12_ref, b12_ref, y1_ref, y2_ref, *, Cout):
    x = x_ref[...].astype(w12_ref.dtype)
    z = jnp.dot(x, w12_ref[...], preferred_element_type=jnp.float32)
    z = z * s12_ref[...] + b12_ref[...]
    a = z * jax.nn.sigmoid(z)                      # SiLU, f32
    y1_ref[...] = a[:, :Cout].astype(y1_ref.dtype)
    y2_ref[...] = a[:, Cout:].astype(y2_ref.dtype)


def c3_stem(x_nhwc, w1, s1, b1, w2, s2, b2, *, tile_m=2048,
            compute_dtype=jnp.float32):
    """x: (N,H,W,Cin); w1,w2: (Cin,Cout). Returns y1, y2 as (N,H,W,Cout)."""
    N, H, W, Cin = x_nhwc.shape
    Cout = w1.shape[1]
    M = N * H * W
    TM = min(tile_m, M)
    x2d = x_nhwc.reshape(M, Cin)
    # cv1 and cv2 share the same input -> one matmul with 2*Cout outputs.
    w12 = jnp.concatenate([w1, w2], axis=1).astype(compute_dtype)
    s12 = jnp.concatenate([s1, s2]).reshape(1, 2 * Cout)
    b12 = jnp.concatenate([b1, b2]).reshape(1, 2 * Cout)
    row = lambda i: (i, 0)
    const = lambda i: (0, 0)
    y1, y2 = pl.pallas_call(
        functools.partial(_stem_kernel, Cout=Cout),
        out_shape=(jax.ShapeDtypeStruct((M, Cout), x_nhwc.dtype),
                   jax.ShapeDtypeStruct((M, Cout), x_nhwc.dtype)),
        grid=(pl.cdiv(M, TM),),
        in_specs=[pl.BlockSpec((TM, Cin), row),
                  pl.BlockSpec((Cin, 2 * Cout), const),
                  pl.BlockSpec((1, 2 * Cout), const),
                  pl.BlockSpec((1, 2 * Cout), const)],
        out_specs=(pl.BlockSpec((TM, Cout), row),
                   pl.BlockSpec((TM, Cout), row)),
        compiler_params=pltpu.CompilerParams(
            dimension_semantics=("parallel",),
            vmem_limit_bytes=_VMEM_LIMIT),
    )(x2d, w12, s12, b12)
    return y1.reshape(N, H, W, Cout), y2.reshape(N, H, W, Cout)


# ----------------------------------------------------------------------------
# Kernel 2: one fused Bottleneck:
#   SiLU(BN(3x3( SiLU(BN(1x1(y))) )))  (+ y)   [+ optional fused cv3 + concat]
# Grid = (N, H/TH). Halo rows arrive as two 1-row blocks with clamped index
# maps; the 1x1 intermediate lives only in VMEM.
# ----------------------------------------------------------------------------
def _bottleneck_kernel(y_ref, top_ref, bot_ref, w1_ref, s1_ref, b1_ref,
                       w3_ref, s3_ref, b3_ref, *rest,
                       TH, W, C, H, shortcut, fuse_cv3):
    if fuse_cv3:
        y2_ref, wca_ref, wcb_ref, sc_ref, bc_ref, o_ref = rest
    else:
        (o_ref,) = rest

    i = pl.program_id(1)
    cdt = w1_ref.dtype          # matmul compute dtype (weights pre-cast)

    def conv1x1_silu(m):        # Bottleneck.cv1 (1x1 conv + BN + SiLU), VMEM only
        z = jnp.dot(m.reshape(-1, C).astype(cdt), w1_ref[...],
                    preferred_element_type=jnp.float32)
        z = z * s1_ref[...] + b1_ref[...]
        return (z * jax.nn.sigmoid(z)).reshape(m.shape[0], W, C)

    main = y_ref[0]                                   # (TH, W, C)
    t_mid = conv1x1_silu(main)
    # The 3x3 zero padding applies to the *output* of the 1x1 stage, so run
    # the 1x1 on the clamped neighbour rows and zero them at the image edges.
    t_top = jnp.where(i > 0, conv1x1_silu(top_ref[0]), 0.0)          # (1,W,C)
    t_bot = jnp.where((i + 1) * TH < H, conv1x1_silu(bot_ref[0]), 0.0)
    t = jnp.concatenate([t_top, t_mid, t_bot], axis=0).astype(cdt)   # (TH+2,W,C)

    # Two W-shifted, zero-padded views built once and reused for every kh.
    zcol = jnp.zeros((TH + 2, 1, C), cdt)
    t_l = jnp.concatenate([zcol, t[:, :W - 1, :]], axis=1)   # column w-1 (kw=0)
    t_r = jnp.concatenate([t[:, 1:, :], zcol], axis=1)       # column w+1 (kw=2)

    # 3x3 conv = 9 accumulated MXU matmuls with K = C each.  Avoids the
    # (TH*W, 9C) im2col buffer and the lane-axis concat/relayout; each tap is
    # only a cheap leading-axis (row) slice of one of 3 resident views.
    z3 = jnp.zeros((TH * W, C), jnp.float32)
    for kh in range(3):
        for kw, tv in enumerate((t_l, t, t_r)):               # kw = 0, 1, 2
            tap = tv[kh:kh + TH].reshape(TH * W, C)
            z3 = z3 + jnp.dot(tap, w3_ref[kh * 3 + kw],
                              preferred_element_type=jnp.float32)
    z3 = z3 * s3_ref[...] + b3_ref[...]
    y = z3 * jax.nn.sigmoid(z3)                       # (TH*W, C) f32
    if shortcut:
        y = y + main.reshape(TH * W, C).astype(jnp.float32)

    if fuse_cv3:
        # cv3(concat([y, y2], ch)) == SiLU(BN(y @ Wa + y2 @ Wb))
        y2 = y2_ref[0].reshape(TH * W, C).astype(cdt)
        zc = (jnp.dot(y.astype(cdt), wca_ref[...],
                      preferred_element_type=jnp.float32)
              + jnp.dot(y2, wcb_ref[...], preferred_element_type=jnp.float32))
        zc = zc * sc_ref[...] + bc_ref[...]
        y = zc * jax.nn.sigmoid(zc)                   # (TH*W, C2)

    o_ref[0] = y.reshape(TH, W, -1).astype(o_ref.dtype)


def _pick_tile_h(H, W, C, budget_bytes=2 << 20):
    """Largest divisor of H whose (TH, W, C) f32 tile fits the budget."""
    th = 1
    for cand in range(1, H + 1):
        if H % cand == 0 and cand * W * C * 4 <= budget_bytes:
            th = cand
    return th


def bottleneck_block(y, blk, *, shortcut=True, tile_h=None, cv3=None, y2=None,
                     compute_dtype=jnp.float32):
    """One Bottleneck(c_, c_, k=((1,1),(3,3)), e=1.0). If cv3/y2 are given,
    the C3 tail (channel concat + cv3 1x1 + BN + SiLU) is fused in as well."""
    # TODO(synk): grouped 3x3 conv (g > 1) not implemented; module default g=1.
    N, H, W, C = y.shape
    TH = tile_h if tile_h is not None else _pick_tile_h(H, W, C)
    if H % TH != 0:
        raise ValueError(f"tile_h={TH} must divide H={H}")
    nH = H // TH
    fuse_cv3 = cv3 is not None

    w1 = blk["w1"].astype(compute_dtype)
    s1 = blk["s1"].reshape(1, C)
    b1 = blk["b1"].reshape(1, C)
    w3 = blk["w3"].reshape(9, C, C).astype(compute_dtype)  # HWIO -> (kh*3+kw,Ci,Co)
    s3 = blk["s3"].reshape(1, C)
    b3 = blk["b3"].reshape(1, C)

    tile = lambda b, i: (b, i, 0, 0)
    halo_top = lambda b, i: (b, jnp.maximum(i * TH - 1, 0), 0, 0)
    halo_bot = lambda b, i: (b, jnp.minimum(i * TH + TH, H - 1), 0, 0)
    const2 = lambda b, i: (0, 0)
    const3 = lambda b, i: (0, 0, 0)

    in_specs = [
        pl.BlockSpec((1, TH, W, C), tile),
        pl.BlockSpec((1, 1, W, C), halo_top),
        pl.BlockSpec((1, 1, W, C), halo_bot),
        pl.BlockSpec((C, C), const2),
        pl.BlockSpec((1, C), const2),
        pl.BlockSpec((1, C), const2),
        pl.BlockSpec((9, C, C), const3),
        pl.BlockSpec((1, C), const2),
        pl.BlockSpec((1, C), const2),
    ]
    args = [y, y, y, w1, s1, b1, w3, s3, b3]

    if fuse_cv3:
        wc, sc, bc = cv3
        C2 = wc.shape[1]
        wc = wc.astype(compute_dtype)
        in_specs += [
            pl.BlockSpec((1, TH, W, C), tile),
            pl.BlockSpec((C, C2), const2),
            pl.BlockSpec((C, C2), const2),
            pl.BlockSpec((1, C2), const2),
            pl.BlockSpec((1, C2), const2),
        ]
        args += [y2, wc[:C], wc[C:], sc.reshape(1, C2), bc.reshape(1, C2)]
        Cout = C2
    else:
        Cout = C

    kernel = functools.partial(
        _bottleneck_kernel, TH=TH, W=W, C=C, H=H,
        shortcut=shortcut, fuse_cv3=fuse_cv3)
    return pl.pallas_call(
        kernel,
        out_shape=jax.ShapeDtypeStruct((N, H, W, Cout), y.dtype),
        grid=(N, nH),
        in_specs=in_specs,
        out_specs=pl.BlockSpec((1, TH, W, Cout), tile),
        compiler_params=pltpu.CompilerParams(
            dimension_semantics=("parallel", "parallel"),
            vmem_limit_bytes=_VMEM_LIMIT),
    )(*args)


# ----------------------------------------------------------------------------
# C3 forward (Pallas)
# ----------------------------------------------------------------------------
def c3_forward(x_nchw, params, n=1, shortcut=True, *, tile_h=None, tile_m=2048,
               compute_dtype=jnp.float32):
    assert n >= 1 and len(params["m"]) >= n
    x = jnp.transpose(x_nchw, (0, 2, 3, 1))            # NCHW -> NHWC
    y1, y2 = c3_stem(x, params["cv1_w"], params["cv1_s"], params["cv1_b"],
                     params["cv2_w"], params["cv2_s"], params["cv2_b"],
                     tile_m=tile_m, compute_dtype=compute_dtype)
    h = y1
    for i in range(n):
        last = i == n - 1
        h = bottleneck_block(
            h, params["m"][i], shortcut=shortcut, tile_h=tile_h,
            cv3=((params["cv3_w"], params["cv3_s"], params["cv3_b"])
                 if last else None),
            y2=y2 if last else None,
            compute_dtype=compute_dtype)
    return jnp.transpose(h, (0, 3, 1, 2))              # NHWC -> NCHW


# ----------------------------------------------------------------------------
# Parameter setup (deterministic, synthetic) + BN folding
# ----------------------------------------------------------------------------
def _fold_bn(gamma, beta, mean, var, eps=1e-3):
    scale = gamma / jnp.sqrt(var + eps)
    return scale, beta - mean * scale


def _rand_bn(key, c):
    k1, k2, k3, k4 = jax.random.split(key, 4)
    gamma = 1.0 + 0.1 * jax.random.normal(k1, (c,), jnp.float32)
    beta = 0.1 * jax.random.normal(k2, (c,), jnp.float32)
    mean = 0.05 * jax.random.normal(k3, (c,), jnp.float32)
    var = jax.random.uniform(k4, (c,), jnp.float32, 0.5, 1.5)
    return _fold_bn(gamma, beta, mean, var)


def init_c3_params(key, c1, c2, n=1, e=0.5):
    c_ = int(c2 * e)
    keys = jax.random.split(key, 6 + 4 * n)
    p = {}
    p["cv1_w"] = 0.3 * jax.random.normal(keys[0], (c1, c_), jnp.float32)
    p["cv1_s"], p["cv1_b"] = _rand_bn(keys[1], c_)
    p["cv2_w"] = 0.3 * jax.random.normal(keys[2], (c1, c_), jnp.float32)
    p["cv2_s"], p["cv2_b"] = _rand_bn(keys[3], c_)
    p["cv3_w"] = 0.3 * jax.random.normal(keys[4], (2 * c_, c2), jnp.float32)
    p["cv3_s"], p["cv3_b"] = _rand_bn(keys[5], c2)
    p["m"] = []
    for i in range(n):
        kw1, kb1, kw3, kb3 = keys[6 + 4 * i: 10 + 4 * i]
        blk = {"w1": 0.3 * jax.random.normal(kw1, (c_, c_), jnp.float32)}
        blk["s1"], blk["b1"] = _rand_bn(kb1, c_)
        blk["w3"] = 0.15 * jax.random.normal(kw3, (3, 3, c_, c_), jnp.float32)
        blk["s3"], blk["b3"] = _rand_bn(kb3, c_)
        p["m"].append(blk)
    return p


# ----------------------------------------------------------------------------
# Pure-JAX reference (for correctness check only)
# ----------------------------------------------------------------------------
def _ref_conv_bn_silu(x_nhwc, w_hwio, scale, bias):
    k = w_hwio.shape[0]
    pad = k // 2
    z = jax.lax.conv_general_dilated(
        x_nhwc, w_hwio, (1, 1), [(pad, pad), (pad, pad)],
        dimension_numbers=("NHWC", "HWIO", "NHWC"),
        precision=jax.lax.Precision.HIGHEST)
    z = z * scale + bias
    return z * jax.nn.sigmoid(z)


def c3_reference(x_nchw, params, n=1, shortcut=True):
    x = jnp.transpose(x_nchw, (0, 2, 3, 1))
    pw = lambda xx, w, s, b: _ref_conv_bn_silu(xx, w.reshape(1, 1, *w.shape), s, b)
    y1 = pw(x, params["cv1_w"], params["cv1_s"], params["cv1_b"])
    y2 = pw(x, params["cv2_w"], params["cv2_s"], params["cv2_b"])
    h = y1
    for blk in params["m"][:n]:
        t = pw(h, blk["w1"], blk["s1"], blk["b1"])
        t = _ref_conv_bn_silu(t, blk["w3"], blk["s3"], blk["b3"])
        h = h + t if shortcut else t
    cat = jnp.concatenate([h, y2], axis=-1)
    out = pw(cat, params["cv3_w"], params["cv3_s"], params["cv3_b"])
    return jnp.transpose(out, (0, 3, 1, 2))


if __name__ == "__main__":
    key = jax.random.PRNGKey(0)
    kx, kp = jax.random.split(key)

    N, C_IN, C_OUT, H, W = 2, 4, 8, 16, 16
    n_blocks = 2   # exercises both the plain and the cv3-fused bottleneck path

    x = jax.random.normal(kx, (N, C_IN, H, W), jnp.float32)   # NCHW input
    params = init_c3_params(kp, C_IN, C_OUT, n=n_blocks)

    # tile_h=8 / tile_m=256 so the grids have >1 step and the halo index maps
    # (interior + clamped edge tiles) are actually exercised at this toy size.
    out = c3_forward(x, params, n=n_blocks, shortcut=True,
                     tile_h=8, tile_m=256)
    out = jax.block_until_ready(out)

    ref = jax.block_until_ready(
        c3_reference(x, params, n=n_blocks, shortcut=True))
    assert out.shape == (N, C_OUT, H, W), out.shape
    err = float(jnp.max(jnp.abs(out - ref)))
    assert jnp.allclose(out, ref, atol=1e-3, rtol=1e-3), err

    print("KERNEL_OK")
</pallas_src>

<mosaic_0001>
module attributes {stable_mosaic.version = 11 : i64} {
  func.func @_stem_kernel(%arg0: i32, %arg1: memref<256x4xf32, #tpu.memory_space<vmem>>, %arg2: memref<4x8xf32, #tpu.memory_space<vmem>>, %arg3: memref<1x8xf32, #tpu.memory_space<vmem>>, %arg4: memref<1x8xf32, #tpu.memory_space<vmem>>, %arg5: memref<256x4xf32, #tpu.memory_space<vmem>>, %arg6: memref<256x4xf32, #tpu.memory_space<vmem>>) attributes {dimension_semantics = [#tpu.dimension_semantics<parallel>], iteration_bounds = array<i64: 2>, scalar_prefetch = 0 : i64, scratch_operands = 0 : i64, tpu.core_type = #tpu.core_type<tc>, window_params = [{transform_indices = @transform_0, window_bounds = array<i64: 256, 4>}, {pipeline_mode = #tpu.pipeline_mode<synchronous>, transform_indices = @transform_1, window_bounds = array<i64: 4, 8>}, {pipeline_mode = #tpu.pipeline_mode<synchronous>, transform_indices = @transform_2, window_bounds = array<i64: 1, 8>}, {pipeline_mode = #tpu.pipeline_mode<synchronous>, transform_indices = @transform_3, window_bounds = array<i64: 1, 8>}, {transform_indices = @transform_4, window_bounds = array<i64: 256, 4>}, {transform_indices = @transform_5, window_bounds = array<i64: 256, 4>}]} {
    %c0 = arith.constant 0 : index
    %c0_0 = arith.constant 0 : index
    %0 = vector.load %arg1[%c0, %c0_0] : memref<256x4xf32, #tpu.memory_space<vmem>>, vector<256x4xf32>
    %c0_1 = arith.constant 0 : index
    %c0_2 = arith.constant 0 : index
    %1 = vector.load %arg2[%c0_1, %c0_2] : memref<4x8xf32, #tpu.memory_space<vmem>>, vector<4x8xf32>
    %cst = arith.constant dense<0.000000e+00> : vector<256x8xf32>
    %2 = tpu.matmul %0, %1, %cst {dimension_numbers = #tpu.dot_dimension_numbers<[1], [0], [0], [1], [0, 0, 1, 1], [], []>} : vector<256x4xf32>, vector<4x8xf32>, vector<256x8xf32> -> vector<256x8xf32>
    %c0_3 = arith.constant 0 : index
    %c0_4 = arith.constant 0 : index
    %3 = vector.load %arg3[%c0_3, %c0_4] : memref<1x8xf32, #tpu.memory_space<vmem>>, vector<1x8xf32>
    %4 = vector.broadcast %3 : vector<1x8xf32> to vector<256x8xf32>
    %5 = arith.mulf %2, %4 : vector<256x8xf32>
    %c0_5 = arith.constant 0 : index
    %c0_6 = arith.constant 0 : index
    %6 = vector.load %arg4[%c0_5, %c0_6] : memref<1x8xf32, #tpu.memory_space<vmem>>, vector<1x8xf32>
    %7 = vector.broadcast %6 : vector<1x8xf32> to vector<256x8xf32>
    %8 = arith.addf %5, %7 : vector<256x8xf32>
    %9 = arith.negf %8 : vector<256x8xf32>
    %10 = math.exp %9 : vector<256x8xf32>
    %cst_7 = arith.constant 1.000000e+00 : f32
    %11 = vector.broadcast %cst_7 : f32 to vector<256x8xf32>
    %12 = arith.addf %11, %10 : vector<256x8xf32>
    %13 = arith.divf %11, %12 : vector<256x8xf32>
    %14 = arith.mulf %8, %13 : vector<256x8xf32>
    %15 = vector.extract_strided_slice %14 {offsets = [0, 0], sizes = [256, 4], strides = [1, 1]} : vector<256x8xf32> to vector<256x4xf32>
    %c0_8 = arith.constant 0 : index
    %c0_9 = arith.constant 0 : index
    %16 = vector.load %arg5[%c0_8, %c0_9] : memref<256x4xf32, #tpu.memory_space<vmem>>, vector<256x4xf32>
    tpu.vector_store %arg5[%c0_8, %c0_9], %15 {strides = array<i32>} : memref<256x4xf32, #tpu.memory_space<vmem>>, vector<256x4xf32>,
    %17 = vector.extract_strided_slice %14 {offsets = [0, 4], sizes = [256, 4], strides = [1, 1]} : vector<256x8xf32> to vector<256x4xf32>
    %c0_10 = arith.constant 0 : index
    %c0_11 = arith.constant 0 : index
    %18 = vector.load %arg6[%c0_10, %c0_11] : memref<256x4xf32, #tpu.memory_space<vmem>>, vector<256x4xf32>
    tpu.vector_store %arg6[%c0_10, %c0_11], %17 {strides = array<i32>} : memref<256x4xf32, #tpu.memory_space<vmem>>, vector<256x4xf32>,
    return
  }
  func.func @transform_0(%arg0: i32) -> (i32, i32) {
    %c0_i32 = arith.constant 0 : i32
    %c0_i32_0 = arith.constant 0 : i32
    return %arg0, %c0_i32 : i32, i32
  }
  func.func @transform_1(%arg0: i32) -> (i32, i32) {
    %c0_i32 = arith.constant 0 : i32
    %c0_i32_0 = arith.constant 0 : i32
    %c0_i32_1 = arith.constant 0 : i32
    return %c0_i32, %c0_i32_0 : i32, i32
  }
  func.func @transform_2(%arg0: i32) -> (i32, i32) {
    %c0_i32 = arith.constant 0 : i32
    %c0_i32_0 = arith.constant 0 : i32
    %c0_i32_1 = arith.constant 0 : i32
    return %c0_i32, %c0_i32_0 : i32, i32
  }
  func.func @transform_3(%arg0: i32) -> (i32, i32) {
    %c0_i32 = arith.constant 0 : i32
    %c0_i32_0 = arith.constant 0 : i32
    %c0_i32_1 = arith.constant 0 : i32
    return %c0_i32, %c0_i32_0 : i32, i32
  }
  func.func @transform_4(%arg0: i32) -> (i32, i32) {
    %c0_i32 = arith.constant 0 : i32
    %c0_i32_0 = arith.constant 0 : i32
    return %arg0, %c0_i32 : i32, i32
  }
  func.func @transform_5(%arg0: i32) -> (i32, i32) {
    %c0_i32 = arith.constant 0 : i32
    %c0_i32_0 = arith.constant 0 : i32
    return %arg0, %c0_i32 : i32, i32
  }
}

</mosaic_0001>

<bundles_post_ra>
// kernel: tpu_custom_call.1
= control target key start
LH: loop header
LB: loop body
LE: loop exit
PB: predicated region body
PF: predicated region fallthrough
CT: control target
= control target key end

     0   :  { %11 = vsyncpa [#allocation3], 0  ;;  %s2743_s0 = inlined_call_operand.hbm [shape: f32[512,4], index: 0, kind: input, shape index: {}]   ;;  %s2744_s1 = inlined_call_operand.hbm [shape: f32[4,8], index: 1, kind: input, shape index: {}]   ;;  %s2745_s2 = inlined_call_operand.hbm [shape: f32[1,8], index: 2, kind: input, shape index: {}]   ;;  %s2746_s3 = inlined_call_operand.hbm [shape: f32[1,8], index: 3, kind: input, shape index: {}]   ;;  %s2747_s4 = inlined_call_operand.hbm [shape: f32[512,4], index: 4, kind: output, shape index: {0}]   ;;  %s2748_s5 = inlined_call_operand.hbm [shape: f32[512,4], index: 5, kind: output, shape index: {1}]  }
   0x1   :  { %13 = vsyncpa [#allocation3 + $0x1], 0 }
   0x2   :  { %14 = vsyncpa [#allocation6], 0 }
   0x3   :  { %15 = vsyncpa [#allocation9], 0 }
   0x4   :  { %16 = vsyncpa [#allocation4], 0 }
   0x5   :  { %18 = vsyncpa [#allocation4 + $0x1], 0 }
   0x6   :  { %19 = vsyncpa [#allocation12], 0 }
   0x7   :  { %21 = vsyncpa [#allocation12 + $0x1], 0  ;;  %s1974_s18 = smov 0   ;;  %s1976_s19 = smov 0  }
   0x8   :  { %s1978_s20 = smov 0   ;;  %s1980_s21 = smov 0  }
   0x9 LB: > { %s1995_s22 = sadd.s32 4294967295, %s1931_s21   ;;  %s1317_s23 = sadd.s32 4294967294, %s1931_s21   ;;  %s1931_s21 = sphi %s1980_s21, %s2771_s21   ;;  %s1927_s20 = sphi %s1978_s20, %s2770_s20   ;;  %s1923_s19 = sphi %s1976_s19, %s2769_s19   ;;  %s1919_s18 = sphi %s1974_s18, %s2768_s18  }
   0xa   : > { %p47_p0 = scmp.ne.s32.totalorder %s1923_s19, %s1919_s18  ;;  %p2749_p1 = scmp.eq.s32.totalorder %s1995_s22, 0 }
   0xb   : > { %p140_p3 = scmp.eq.s32.totalorder %s1317_s23, 1  ;;  %p1318_p5 = scmp.ge.s32.totalorder %s1931_s21, 1 }
   0xc   : > { %p2004_p4 = por %p2749_p1, %p47_p0  ;;  %p173_p7 = scmp.lt.s32.totalorder %s1931_s21, 3 }
   0xd   : > { %p2009_p6 = por %p140_p3, %p47_p0  ;;  %s1933_s27 = smov [#allocation5]  }
   0xe   : > { %s2752_s24 = scalar_select %p2004_p4, 1, 0 }
   0xf   : > { %s2753_s25 = scalar_select %p2009_p6, 1, 0 }
  0x10   : > { %p2014_p8 = pnand %p1318_p5, %p173_p7  ;;  %s186_s28 = sshll.u32 %s1933_s27, 4  ;;  %s187_s28 = int_to_ptr.vmem [resolvable:$true] %s186_s28 }
  0x11   : > { %s1934_s29 = smov [#allocation7]   ;;  %s1935_s7 = smov [#allocation8]  }
  0x12   : > { %s2754_s26 = scalar_select %p2014_p8, 1, 0 }
  0x13   : > { %p1514_p10 = pneg %p2014_p8  ;;  %s197_s30 = sshll.u32 %s1934_s29, 4  ;;  %s2027_s30 = int_to_ptr.vmem [resolvable:$true] %s197_s30 }
  0x14   : > { %s208_s8 = sshll.u32 %s1935_s7, 4  ;;  %s1711_s11 = scalar_lea.hbm %s2744_s1, 64  ;;  %s2029_s8 = int_to_ptr.vmem [resolvable:$true] %s208_s8 }
  0x15   : > { %p2023_p11 = pnand %p1514_p10, %p2749_p1  ;;  %p1712_p12 = scmp.ne.s32.totalorder %s2744_s1, %s1711_s11 }
  0x16   : > { %p1718_p5 = scmp.lt.u32.totalorder %s1711_s11, %s2744_s1 }
  0x17   : > { %p2039_p13 = pneg %p2023_p11 }
  0x19   : > { %p1714_p0 = pnand %p2039_p13, %p1712_p12 }
  0x1b   : > { %p1715_p3 = pneg %p1714_p0 }
  0x1d   : > { %p1720_p7 = pnand %p1718_p5, %p1715_p3 }
  0x1f   : > { %1723 = shalt.err (!%p1720_p7)
}
  0x20   : > { %s1724_s17 = scalar_lea.vmem %s187_s28, 64  ;;  %p1732_p2 = scmp.lt.s32.totalorder %s187_s28, %s187_s28 }
  0x21   : > { %p1725_p10 = scmp.ne.s32.totalorder %s187_s28, %s1724_s17  ;;  %p1733_p6 = scmp.lt.s32.totalorder %s1724_s17, %s1724_s17 }
  0x23   : > { %p1727_p9 = pnand %p1725_p10, %p2039_p13  ;;  %p1734_p4 = por %p1733_p6, %p1732_p2 }
  0x25   : > { %p1728_p1 = pneg %p1727_p9 }
  0x27   : > { %p1735_p8 = pnand %p1734_p4, %p1728_p1 }
  0x29   : > { %1738 = shalt.err (!%p1735_p8)
}
  0x2a   : > { %1517 = dma.hbm_to_vmem [thread:$0]  (!%p2023_p11), %s2744_s1, 64, %s187_s28, [#allocation6]  }
  0x2b   : > { %s1739_s9 = scalar_lea.hbm %s2745_s2, 16 }
  0x2c   : > { %p1740_p9 = scmp.ne.s32.totalorder %s2745_s2, %s1739_s9  ;;  %p1746_p1 = scmp.lt.u32.totalorder %s1739_s9, %s2745_s2 }
  0x2e   : > { %p1742_p12 = pnand %p1740_p9, %p2039_p13 }
  0x30   : > { %p1743_p2 = pneg %p1742_p12 }
  0x32   : > { %p1748_p4 = pnand %p1746_p1, %p1743_p2 }
  0x34   : > { %1751 = shalt.err (!%p1748_p4)
}
  0x35   : > { %s1752_s28 = scalar_lea.vmem %s2027_s30, 16  ;;  %s1759_s15 = scalar_lea.vmem %s2027_s30, 32 }
  0x36   : > { %p1753_p6 = scmp.ne.s32.totalorder %s2027_s30, %s1752_s28  ;;  %p1760_p3 = scmp.lt.s32.totalorder %s2027_s30, %s2027_s30 }
  0x37   : > { %p1761_p5 = scmp.lt.s32.totalorder %s1759_s15, %s1752_s28 }
  0x38   : > { %p1755_p8 = pnand %p1753_p6, %p2039_p13 }
  0x39   : > { %p1762_p7 = por %p1761_p5, %p1760_p3 }
  0x3a   : > { %p1756_p0 = pneg %p1755_p8 }
  0x3c   : > { %p1763_p10 = pnand %p1762_p7, %p1756_p0 }
  0x3e   : > { %1766 = shalt.err (!%p1763_p10)
}
  0x3f   : > { %1520 = dma.hbm_to_vmem [thread:$0]  (!%p2023_p11), %s2745_s2, 16, %s2027_s30, [#allocation6]  }
  0x40   : > { %s1767_s29 = scalar_lea.hbm %s2746_s3, 16 }
  0x41   : > { %p1768_p9 = scmp.ne.s32.totalorder %s2746_s3, %s1767_s29  ;;  %p1774_p1 = scmp.lt.u32.totalorder %s1767_s29, %s2746_s3 }
  0x43   : > { %p1770_p12 = pnand %p1768_p9, %p2039_p13 }
  0x45   : > { %p1771_p2 = pneg %p1770_p12 }
  0x47   : > { %p1776_p4 = pnand %p1774_p1, %p1771_p2 }
  0x49   : > { %1779 = shalt.err (!%p1776_p4)
}
  0x4a   : > { %s1780_s30 = scalar_lea.vmem %s2029_s8, 16  ;;  %s1787_s12 = scalar_lea.vmem %s2029_s8, 32 }
  0x4b   : > { %p1781_p6 = scmp.ne.s32.totalorder %s2029_s8, %s1780_s30  ;;  %p1788_p3 = scmp.lt.s32.totalorder %s2029_s8, %s2029_s8 }
  0x4c   : > { %p1789_p5 = scmp.lt.s32.totalorder %s1787_s12, %s1780_s30 }
  0x4d   : > { %p1783_p8 = pnand %p1781_p6, %p2039_p13 }
  0x4e   : > { %p1790_p7 = por %p1789_p5, %p1788_p3 }
  0x4f   : > { %p1784_p0 = pneg %p1783_p8 }
  0x51   : > { %p1791_p10 = pnand %p1790_p7, %p1784_p0 }
  0x53   : > { %1794 = shalt.err (!%p1791_p10)
}
  0x54   : > { %1523 = dma.hbm_to_vmem [thread:$0]  (!%p2023_p11), %s2746_s3, 16, %s2029_s8, [#allocation9]  }
  0x55   : > { %s2104_s14 = sadd.s32 1, %s1931_s21   ;;  %s34_s15 = sadd.s32 1, %s1927_s20 }
  0x56   : > { %s31_s6 = ssub.s32 %s1931_s21, %s2104_s14  ;;  %p41_p9 = scmp.ne.s32.totalorder %s1927_s20, %s1923_s19 }
  0x57   : > { %p32_p13 = scmp.eq.s32.totalorder %s31_s6, 0  ;;  %p42_p12 = scmp.eq.s32.totalorder %s1931_s21, 0 }
  0x58   : > { %p1538_p2 = scmp.lt.s32.totalorder %s1931_s21, 2  ;;  %p2757_p4 = scmp.eq.s32.totalorder %s1995_s22, 1 }
  0x59   : > { %s2114_s16 = scalar_select %p32_p13, %s1927_s20, %s34_s15  }
  0x5a   : > { %p43_p1 = por %p42_p12, %p41_p9  ;;  %p2118_p6 = por %p2757_p4, %p41_p9 }
  0x5b   : > { %s219_s23 = sand.u32 1, %s1927_s20   ;;  %s1408_s27 = sshll.u32 %s1931_s21, 12 }
  0x5c   : > { %s1323_s8 = sshll.u32 %s219_s23, 8  ;;  %s2127_s9 = scalar_lea.hbm %s2743_s0, %s1408_s27 }
  0x5d   : > { %s223_s10 = scalar_lea.vmem [#allocation2], %s1323_s8  ;;  %p2129_p11 = pnand %p1538_p2, %p43_p1 }
  0x5e   : > { %s230_s11 = sshll.u32 %s223_s10, 4  ;;  %s2135_s12 = scalar_lea.sflag [#allocation3], %s219_s23  ;;  %s2133_s11 = int_to_ptr.vmem [resolvable:$true] %s230_s11 }
  0x5f   : > { %s1795_s13 = scalar_lea.hbm %s2127_s9, 4096  ;;  %p1797_p0 = pneg %p2129_p11 }
  0x60   : > { %p1796_p8 = scmp.ne.s32.totalorder %s2127_s9, %s1795_s13  ;;  %s1800_s15 = scalar_lea.hbm %s2743_s0, 8192 }
  0x61   : > { %p1801_p7 = scmp.lt.u32.totalorder %s2127_s9, %s2743_s0  ;;  %p1802_p10 = scmp.lt.u32.totalorder %s1800_s15, %s1795_s13 }
  0x62   : > { %p1798_p3 = pnand %p1797_p0, %p1796_p8  ;;  %p1804_p9 = scmp.lt.u32.totalorder %s1795_s13, %s2127_s9 }
  0x63   : > { %p1803_p13 = por %p1802_p10, %p1801_p7 }
  0x64   : > { %p1799_p5 = pneg %p1798_p3 }
  0x65   : > { %p1805_p12 = por %p1804_p9, %p1803_p13 }
  0x67   : > { %p1806_p2 = pnand %p1805_p12, %p1799_p5 }
  0x69   : > { %1809 = shalt.err (!%p1806_p2)
}
  0x6a   : > { %s1810_s23 = scalar_lea.vmem %s2133_s11, 4096  ;;  %s1936_s29 = smov [#allocation2]  }
  0x6b   : > { %p1811_p1 = scmp.ne.s32.totalorder %s2133_s11, %s1810_s23  ;;  %s1815_s7 = sshll.u32 %s1936_s29, 4  ;;  %s1816_s7 = int_to_ptr.vmem [resolvable:$false] %s1815_s7 }
  0x6c   : > { %s1817_s10 = scalar_lea.vmem %s1816_s7, 8192  ;;  %p1818_p3 = scmp.lt.s32.totalorder %s2133_s11, %s1816_s7 }
  0x6d   : > { %p1813_p4 = pnand %p1811_p1, %p1797_p0  ;;  %p1819_p7 = scmp.lt.s32.totalorder %s1817_s10, %s1810_s23 }
  0x6f   : > { %p1814_p8 = pneg %p1813_p4  ;;  %p1820_p10 = por %p1819_p7, %p1818_p3 }
  0x71   : > { %p1821_p13 = pnand %p1820_p10, %p1814_p8 }
  0x73   : > { %1824 = shalt.err (!%p1821_p13)
}
  0x74   : > { %s1937_s13 = smov 128   ;;  %s1938_s28 = smov 8  }
  0x75   : > { %1527 = dma.hbm_to_vmem [thread:$0]  (!%p2129_p11), %s2127_s9, 4096, %s2133_s11, %s2135_s12, %s1937_s13, %s1937_s13, %s1938_s28  }
  0x76   : > { %p2760_p0 = scmp.ne.s32.totalorder %s2754_s26, 0 }
  0x77   : > { %s2166_s6 = sand.u32 (!%p2760_p0), 1, %s1923_s19   ;;  %p2761_p5 = scmp.ne.s32.totalorder (!%p2760_p0), %s2752_s24, 0 }
  0x78   : > { %242 = sbr.rel (%p2760_p0) target bundleno = 587 (0x24b), region = 36  ;;  %s2169_s15 = sshll.u32 (!%p2760_p0), %s2166_s6, 8 }
  0x79   : > { %s245_s27 = scalar_lea.sflag (!%p2760_p0), [#allocation3], %s2166_s6  ;;  %s2173_s8 = scalar_lea.vmem (!%p2760_p0), [#allocation2], %s2169_s15 }
  0x7f   : > { %1898 = dma.done.wait (%p2761_p5), %s245_s27, 4096  }
  0x80   : > { %1900 = vsyncadd (%p2761_p5), %s245_s27, 4294963200  ;;  %p2762_p11 = scmp.eq.s32.totalorder %s1995_s22, 0 }
  0x82   : > { %1902 = dma.done.wait (%p2762_p11), [#allocation6], 80   ;;  %p2763_p9 = pmov %p2762_p11 }
  0x84   : > { %1904 = vsyncadd (%p2763_p9), [#allocation6], 4294967216  ;;  %p2764_p12 = pmov %p2763_p9 }
  0x85   : > { %p2765_p2 = pmov %p2763_p9 }
  0x86   : > { %1906 = dma.done.wait (%p2764_p12), [#allocation9], 16  }
  0x87   : > { %1908 = vsyncadd (%p2765_p2), [#allocation9], 4294967280  ;;  %vm425_vm0 = vcmask 1043456   ;;  %v327_v0 = vld [vmem:[#allocation5] sm:$0xf]  ;;  %vm328_vm1 = vcmask 31744  }
  0x88   : > { %v295_v1 = vld [vmem:[%s2173_s8] sm:$0xff]  ;;  %1444 = vmatprep.subr.msk.mxu0 %vm425_vm0, %v327_v0  ;;  %1494 = vmatprep.subr.msk.mxu1 %vm425_vm0, %v327_v0  ;;  %v296_v3 = vld [vmem:[%s2173_s8 + $0x8] sm:$0xff]  ;;  %v297_v5 = vld [vmem:[%s2173_s8 + $0x10] sm:$0xff]  ;;  %s1939_s24 = smov 124   ;;  %s2396_s26 = scalar_lea.vmem [#allocation10], %s2169_s15 }
  0x89   : > { %v311_v2 = vld [vmem:[%s2173_s8 + $0x80] sm:$0xff]  ;;  %v312_v4 = vld [vmem:[%s2173_s8 + $0x88] sm:$0xff]  ;;  %1445 = vmatpush3.msk.msra.mxu0 %vm425_vm0, %v327_v0  ;;  %1495 = vmatpush3.msk.msra.mxu1 %vm425_vm0, %v327_v0  ;;  %v313_v6 = vld [vmem:[%s2173_s8 + $0x90] sm:$0xff]  ;;  %s1409_s9 = sshll.u32 %s1995_s22, 12  ;;  %s1167_s11 = sshll.u32 %s2396_s26, 4  ;;  %s2582_s11 = int_to_ptr.vmem [resolvable:$true] %s1167_s11 }
  0x8a   : > { %1446 = vmatprep.mubr.msk.f32.mxu0 %vm328_vm1, %v295_v1  ;;  %1470 = vmatprep.mubr.msk.f32.mxu1 %vm328_vm1, %v311_v2  ;;  %v298_v7 = vld [vmem:[%s2173_s8 + $0x18] sm:$0xff]  ;;  %v299_v9 = vld [vmem:[%s2173_s8 + $0x20] sm:$0xff]  ;;  %v300_v11 = vld [vmem:[%s2173_s8 + $0x28] sm:$0xff]  ;;  %s2580_s23 = scalar_lea.hbm %s2747_s4, %s1409_s9  ;;  %s1149_s29 = scalar_lea.sflag [#allocation4], %s2166_s6 }
  0x8b   : > { %1447 = vmatmul.mubr.msk.f32.vlgmr.msra.gmra.mrb[0].mxu0 %vm328_vm1, %v296_v3  ;;  %1471 = vmatmul.mubr.msk.f32.vlgmr.msra.gmra.mrb[0].mxu1 %vm328_vm1, %v312_v4  ;;  %v314_v8 = vld [vmem:[%s2173_s8 + $0x98] sm:$0xff]  ;;  %v315_v10 = vld [vmem:[%s2173_s8 + $0xa0] sm:$0xff]  ;;  %v316_v12 = vld [vmem:[%s2173_s8 + $0xa8] sm:$0xff]  ;;  %s1825_s7 = scalar_lea.vmem %s2582_s11, 4096  ;;  %s1940_s10 = smov [#allocation10]  }
  0x8c   : > { %1449 = vmatprep.mubr.msk.f32.mxu0 %vm328_vm1, %v297_v5  ;;  %1473 = vmatprep.mubr.msk.f32.mxu1 %vm328_vm1, %v313_v6  ;;  %v301_v13 = vld [vmem:[%s2173_s8 + $0x30] sm:$0xff]  ;;  %v302_v15 = vld [vmem:[%s2173_s8 + $0x38] sm:$0xff]  ;;  %v303_v17 = vld [vmem:[%s2173_s8 + $0x40] sm:$0xff]  ;;  %p1826_p1 = scmp.ne.s32.totalorder %s2582_s11, %s1825_s7  ;;  %s1829_s13 = sshll.u32 %s1940_s10, 4  ;;  %s1830_s13 = int_to_ptr.vmem [resolvable:$false] %s1829_s13 }
  0x8d   : > { %v317_v14 = vld [vmem:[%s2173_s8 + $0xb0] sm:$0xff]  ;;  %v318_v16 = vld [vmem:[%s2173_s8 + $0xb8] sm:$0xff]  ;;  %v319_v18 = vld [vmem:[%s2173_s8 + $0xc0] sm:$0xff]  ;;  %s1831_s28 = scalar_lea.vmem %s1830_s13, 8192  ;;  %p1832_p3 = scmp.lt.s32.totalorder %s2582_s11, %s1830_s13 }
  0x8e   : > { %v304_v19 = vld [vmem:[%s2173_s8 + $0x48] sm:$0xff]  ;;  %v305_v21 = vld [vmem:[%s2173_s8 + $0x50] sm:$0xff]  ;;  %v306_v23 = vld [vmem:[%s2173_s8 + $0x58] sm:$0xff]  ;;  %p1827_p4 = pnand %p1826_p1, %p2118_p6  ;;  %p1833_p7 = scmp.lt.s32.totalorder %s1831_s28, %s1825_s7 }
  0x8f   : > { %1450 = vmatmul.mubr.msk.f32.gmra.mrb[2].mxu0 %vm328_vm1, %v298_v7  ;;  %1474 = vmatmul.mubr.msk.f32.gmra.mrb[2].mxu1 %vm328_vm1, %v314_v8  ;;  %v320_v20 = vld [vmem:[%s2173_s8 + $0xc8] sm:$0xff]  ;;  %v321_v22 = vld [vmem:[%s2173_s8 + $0xd0] sm:$0xff]  ;;  %v322_v24 = vld [vmem:[%s2173_s8 + $0xd8] sm:$0xff] }
  0x90   : > { %1452 = vmatprep.mubr.msk.f32.mxu0 %vm328_vm1, %v299_v9  ;;  %1476 = vmatprep.mubr.msk.f32.mxu1 %vm328_vm1, %v315_v10  ;;  %v307_v25 = vld [vmem:[%s2173_s8 + $0x60] sm:$0xff]  ;;  %v308_v27 = vld [vmem:[%s2173_s8 + $0x68] sm:$0xff]  ;;  %v309_v29 = vld [vmem:[%s2173_s8 + $0x70] sm:$0xff]  ;;  %p1828_p8 = pneg %p1827_p4  ;;  %p1834_p10 = por %p1833_p7, %p1832_p3 }
  0x91   : > { %v323_v26 = vld [vmem:[%s2173_s8 + $0xe0] sm:$0xff]  ;;  %v324_v28 = vld [vmem:[%s2173_s8 + $0xe8] sm:$0xff]  ;;  %v325_v30 = vld [vmem:[%s2173_s8 + $0xf0] sm:$0xff] }
  0x92   : > { %v310_v31 = vld [vmem:[%s2173_s8 + $0x78] sm:$0xff]  ;;  %v2251_v33 = vld [vmem:[#allocation7] ss:$0 sm:$0xff]  ;;  %v2253_v35 = vld [vmem:[#allocation8] ss:$0 sm:$0xff]  ;;  %p1835_p13 = pnand %p1834_p10, %p1828_p8 }
  0x93   : > { %1453 = vmatmul.mubr.msk.f32.gmra.mrb[4].mxu0 %vm328_vm1, %v300_v11  ;;  %1477 = vmatmul.mubr.msk.f32.gmra.mrb[4].mxu1 %vm328_vm1, %v316_v12  ;;  %v326_v32 = vld [vmem:[%s2173_s8 + $0xf8] sm:$0xff] }
  0x94   : > { %1455 = vmatprep.mubr.msk.f32.mxu0 %vm328_vm1, %v301_v13  ;;  %1479 = vmatprep.mubr.msk.f32.mxu1 %vm328_vm1, %v317_v14 }
  0x97   : > { %1456 = vmatmul.mubr.msk.f32.gmra.mrb[6].mxu0 %vm328_vm1, %v302_v15  ;;  %1480 = vmatmul.mubr.msk.f32.gmra.mrb[6].mxu1 %vm328_vm1, %v318_v16 }
  0x98   : > { %1458 = vmatprep.mubr.msk.f32.mxu0 %vm328_vm1, %v303_v17  ;;  %1482 = vmatprep.mubr.msk.f32.mxu1 %vm328_vm1, %v319_v18 }
  0x9b   : > { %1459 = vmatmul.mubr.msk.f32.gmra.mrb[8].mxu0 %vm328_vm1, %v304_v19  ;;  %1483 = vmatmul.mubr.msk.f32.gmra.mrb[8].mxu1 %vm328_vm1, %v320_v20 }
  0x9c   : > { %1461 = vmatprep.mubr.msk.f32.mxu0 %vm328_vm1, %v305_v21  ;;  %1485 = vmatprep.mubr.msk.f32.mxu1 %vm328_vm1, %v321_v22 }
  0x9f   : > { %1462 = vmatmul.mubr.msk.f32.gmra.mrb[10].mxu0 %vm328_vm1, %v306_v23  ;;  %1486 = vmatmul.mubr.msk.f32.gmra.mrb[10].mxu1 %vm328_vm1, %v322_v24 }
  0xa0   : > { %1464 = vmatprep.mubr.msk.f32.mxu0 %vm328_vm1, %v307_v25  ;;  %1488 = vmatprep.mubr.msk.f32.mxu1 %vm328_vm1, %v323_v26 }
  0xa3   : > { %1465 = vmatmul.mubr.msk.f32.gmra.mrb[12].mxu0 %vm328_vm1, %v308_v27  ;;  %1489 = vmatmul.mubr.msk.f32.gmra.mrb[12].mxu1 %vm328_vm1, %v324_v28 }
  0xa4   : > { %1467 = vmatprep.mubr.msk.f32.mxu0 %vm328_vm1, %v309_v29  ;;  %1491 = vmatprep.mubr.msk.f32.mxu1 %vm328_vm1, %v325_v30 }
  0xa7   : > { %1468 = vmatmul.mubr.msk.f32.gmra.mrb[14].mxu0 %vm328_vm1, %v310_v31  ;;  %1492 = vmatmul.mubr.msk.f32.gmra.mrb[14].mxu1 %vm328_vm1, %v326_v32 }
 0x15e   : > { %v1448_v34 = vpop.f32.mrb[0].mxu0  ;;  %v1472_v36 = vpop.f32.mrb[0].mxu1 }
 0x15f   : > { %v662_v37 = vmul.f32 %v1448_v34, %v2251_v33  ;;  %v678_v38 = vmul.f32 %v1472_v36, %v2251_v33  ;;  %v495_v39 = vpop.f32.mrb[1].mxu0  ;;  %v575_v40 = vpop.f32.mrb[1].mxu1 }
 0x160   : > { %v661_v41 = vmul.f32 %v2251_v33, %v495_v39  ;;  %v677_v42 = vmul.f32 %v2251_v33, %v575_v40 }
 0x161   : > { %v2260_v43 = vadd.f32 %v2253_v35, %v662_v37  ;;  %v2263_v44 = vadd.f32 %v2253_v35, %v678_v38 }
 0x162   : > { %v2266_v45 = vadd.f32 %v2253_v35, %v661_v41  ;;  %v2269_v46 = vadd.f32 %v2253_v35, %v677_v42  ;;  %v1451_v47 = vpop.f32.mrb[2].mxu0  ;;  %v1475_v48 = vpop.f32.mrb[2].mxu1 }
 0x163   : > { %v1369_v49 = vmul.f32 -1.442695, %v2260_v43  ;;  %v1385_v50 = vmul.f32 -1.442695, %v2263_v44  ;;  %v664_v51 = vmul.f32 %v1451_v47, %v2251_v33  ;;  %v680_v52 = vmul.f32 %v1475_v48, %v2251_v33  ;;  %v505_v53 = vpop.f32.mrb[3].mxu0  ;;  %v585_v54 = vpop.f32.mrb[3].mxu1 }
 0x164   : > { %v1368_v55 = vmul.f32 -1.442695, %v2266_v45  ;;  %v1384_v56 = vmul.f32 -1.442695, %v2269_v46  ;;  %v663_v57 = vmul.f32 %v2251_v33, %v505_v53  ;;  %v679_v58 = vmul.f32 %v2251_v33, %v585_v54 }
 0x165   : > { %1583 = vpow2.f32 %v1369_v49  ;;  %v2280_v59 = vadd.f32 %v2253_v35, %v664_v51  ;;  %v2283_v60 = vadd.f32 %v2253_v35, %v680_v52 }
 0x166   : > { %1585 = vpow2.f32 %v1385_v50  ;;  %v2286_v61 = vadd.f32 %v2253_v35, %v663_v57  ;;  %v2289_v62 = vadd.f32 %v2253_v35, %v679_v58  ;;  %v1454_v63 = vpop.f32.mrb[4].mxu0  ;;  %v1478_v0 = vpop.f32.mrb[4].mxu1 }
 0x167   : > { %1587 = vpow2.f32 %v1368_v55  ;;  %v1371_v1 = vmul.f32 -1.442695, %v2280_v59  ;;  %v1387_v2 = vmul.f32 -1.442695, %v2283_v60  ;;  %v666_v3 = vmul.f32 %v1454_v63, %v2251_v33  ;;  %v515_v4 = vpop.f32.mrb[5].mxu0  ;;  %v595_v5 = vpop.f32.mrb[5].mxu1 }
 0x168   : > { %1589 = vpow2.f32 %v1384_v56  ;;  %v1370_v6 = vmul.f32 -1.442695, %v2286_v61  ;;  %v1386_v7 = vmul.f32 -1.442695, %v2289_v62  ;;  %v682_v8 = vmul.f32 %v1478_v0, %v2251_v33 }
 0x169   : > { %1591 = vpow2.f32 %v1371_v1  ;;  %v2298_v9 = vadd.f32 %v2253_v35, %v666_v3  ;;  %v665_v10 = vmul.f32 %v2251_v33, %v515_v4  ;;  %v681_v11 = vmul.f32 %v2251_v33, %v595_v5 }
 0x16a   : > { %1593 = vpow2.f32 %v1387_v2  ;;  %v2303_v12 = vadd.f32 %v2253_v35, %v682_v8  ;;  %v1457_v13 = vpop.f32.mrb[6].mxu0  ;;  %v1481_v14 = vpop.f32.mrb[6].mxu1 }
 0x16b   : > { %1595 = vpow2.f32 %v1370_v6  ;;  %v1373_v15 = vmul.f32 -1.442695, %v2298_v9  ;;  %v2307_v16 = vadd.f32 %v2253_v35, %v665_v10  ;;  %v2310_v17 = vadd.f32 %v2253_v35, %v681_v11  ;;  %v525_v18 = vpop.f32.mrb[7].mxu0  ;;  %v605_v19 = vpop.f32.mrb[7].mxu1 }
 0x16c   : > { %1597 = vpow2.f32 %v1386_v7  ;;  %v1389_v20 = vmul.f32 -1.442695, %v2303_v12  ;;  %v668_v26 = vmul.f32 %v1457_v13, %v2251_v33  ;;  %v684_v31 = vmul.f32 %v1481_v14, %v2251_v33 }
 0x16d   : > { %1599 = vpow2.f32 %v1373_v15  ;;  %v1372_v21 = vmul.f32 -1.442695, %v2307_v16  ;;  %v1388_v22 = vmul.f32 -1.442695, %v2310_v17  ;;  %v667_v38 = vmul.f32 %v2251_v33, %v525_v18 }
 0x16e   : > { %1601 = vpow2.f32 %v1389_v20  ;;  %v1460_v23 = vpop.f32.mrb[8].mxu0  ;;  %v1484_v24 = vpop.f32.mrb[8].mxu1  ;;  %v2319_v47 = vadd.f32 %v2253_v35, %v668_v26  ;;  %v2322_v51 = vadd.f32 %v2253_v35, %v684_v31  ;;  %v683_v55 = vmul.f32 %v2251_v33, %v605_v19 }
 0x16f   : > { %v1584_v25 = vpop.eup %1583  ;;  %1603 = vpow2.f32 %v1372_v21  ;;  %v535_v27 = vpop.f32.mrb[9].mxu0  ;;  %v2326_v58 = vadd.f32 %v2253_v35, %v667_v38  ;;  %v670_v63 = vmul.f32 %v1460_v23, %v2251_v33  ;;  %v686_v5 = vmul.f32 %v1484_v24, %v2251_v33 }
 0x170   : > { %v615_v28 = vpop.f32.mrb[9].mxu1  ;;  %v1586_v29 = vpop.eup %1585  ;;  %v829_v30 = vadd.f32 1.0, %v1584_v25  ;;  %1605 = vpow2.f32 %v1388_v22  ;;  %v1375_v4 = vmul.f32 -1.442695, %v2319_v47  ;;  %v1391_v11 = vmul.f32 -1.442695, %v2322_v51 }
 0x171   : > { %v1588_v32 = vpop.eup %1587  ;;  %v845_v34 = vadd.f32 1.0, %v1586_v29  ;;  %v669_v13 = vmul.f32 %v2251_v33, %v535_v27  ;;  %v2340_v18 = vadd.f32 %v2253_v35, %v683_v55  ;;  %v685_v19 = vmul.f32 %v2251_v33, %v615_v28 }
 0x172   : > { %v1590_v36 = vpop.eup %1589  ;;  %1607 = vrcp.f32 %v829_v30  ;;  %v828_v37 = vadd.f32 1.0, %v1588_v32  ;;  %v1463_v39 = vpop.f32.mrb[10].mxu0  ;;  %v2344_v22 = vadd.f32 %v2253_v35, %v670_v63  ;;  %v2352_v27 = vadd.f32 %v2253_v35, %v686_v5 }
 0x173   : > { %v1487_v40 = vpop.f32.mrb[10].mxu1  ;;  %v1592_v41 = vpop.eup %1591  ;;  %1609 = vrcp.f32 %v845_v34  ;;  %v844_v42 = vadd.f32 1.0, %v1590_v36  ;;  %v672_v23 = vmul.f32 %v1463_v39, %v2251_v33  ;;  %v1374_v32 = vmul.f32 -1.442695, %v2326_v58 }
 0x174   : > { %v545_v48 = vpop.f32.mrb[11].mxu0  ;;  %v1594_v49 = vpop.eup %1593  ;;  %1611 = vrcp.f32 %v828_v37  ;;  %v831_v50 = vadd.f32 1.0, %v1592_v41  ;;  %v688_v29 = vmul.f32 %v1487_v40, %v2251_v33  ;;  %v2361_v34 = vadd.f32 %v2253_v35, %v669_v13 }
 0x175   : > { %v625_v52 = vpop.f32.mrb[11].mxu1  ;;  %v1596_v53 = vpop.eup %1595  ;;  %1613 = vrcp.f32 %v844_v42  ;;  %v847_v54 = vadd.f32 1.0, %v1594_v49  ;;  %v671_v36 = vmul.f32 %v2251_v33, %v545_v48  ;;  %v1390_v38 = vmul.f32 -1.442695, %v2340_v18 }
 0x176   : > { %v1598_v56 = vpop.eup %1597  ;;  %1615 = vrcp.f32 %v831_v50  ;;  %v830_v57 = vadd.f32 1.0, %v1596_v53  ;;  %v1466_v0 = vpop.f32.mrb[12].mxu0  ;;  %v2366_v39 = vadd.f32 %v2253_v35, %v685_v19  ;;  %v687_v40 = vmul.f32 %v2251_v33, %v625_v52 }
 0x177   : > { %v2329_v1 = vpop.f32.mrb[12].mxu1  ;;  %v1600_v2 = vpop.eup %1599  ;;  %1617 = vrcp.f32 %v847_v54  ;;  %v846_v3 = vadd.f32 1.0, %v1598_v56  ;;  %v1377_v42 = vmul.f32 -1.442695, %v2344_v22  ;;  %v2371_v49 = vadd.f32 %v2253_v35, %v672_v23 }
 0x178   : > { %v2333_v6 = vpop.f32.mrb[13].mxu0  ;;  %v2335_v7 = vpop.f32.mrb[13].mxu1  ;;  %1619 = vrcp.f32 %v830_v57  ;;  %v833_v10 = vadd.f32 1.0, %v1600_v2  ;;  %v674_v50 = vmul.f32 %v1466_v0, %v2251_v33  ;;  %v1393_v48 = vmul.f32 -1.442695, %v2352_v27 }
 0x179   : > { %v1602_v8 = vpop.eup %1601  ;;  %1621 = vrcp.f32 %v846_v3  ;;  %v2376_v54 = vadd.f32 %v2253_v35, %v688_v29  ;;  %v1376_v52 = vmul.f32 -1.442695, %v2361_v34  ;;  %v2380_v56 = vadd.f32 %v2253_v35, %v671_v36 }
 0x17a   : > { %v1604_v14 = vpop.eup %1603  ;;  %v849_v15 = vadd.f32 1.0, %v1602_v8  ;;  %1623 = vrcp.f32 %v833_v10  ;;  %v2347_v24 = vpop.f32.mrb[14].mxu0  ;;  %v1392_v63 = vmul.f32 -1.442695, %v2366_v39  ;;  %v2384_v0 = vadd.f32 %v2253_v35, %v687_v40 }
 0x17b   : > { %v1606_v20 = vpop.eup %1605  ;;  %v832_v21 = vadd.f32 1.0, %v1604_v14  ;;  %v2349_v25 = vpop.f32.mrb[14].mxu1  ;;  %v1379_v3 = vmul.f32 -1.442695, %v2371_v49  ;;  %v1395_v10 = vmul.f32 -1.442695, %v2376_v54  ;;  %v690_v40 = vmul.f32 %v2329_v1, %v2251_v33 }
 0x17c   : > { %1625 = vrcp.f32 %v849_v15  ;;  %v848_v26 = vadd.f32 1.0, %v1606_v20  ;;  %v2355_v28 = vpop.f32.mrb[15].mxu0  ;;  %v2357_v30 = vpop.f32.mrb[15].mxu1  ;;  %v1378_v14 = vmul.f32 -1.442695, %v2380_v56  ;;  %v676_v1 = vmul.f32 %v2347_v24, %v2251_v33 }
 0x17d   : > { %v1608_v31 = vpop.eup %1607  ;;  %1627 = vrcp.f32 %v832_v21  ;;  %v1394_v19 = vmul.f32 -1.442695, %v2384_v0  ;;  %v692_v24 = vmul.f32 %v2349_v25, %v2251_v33 }
 0x17e   : > { %v1610_v37 = vpop.eup %1609  ;;  %1629 = vrcp.f32 %v848_v26 }
 0x17f   : > { %v1612_v41 = vpop.eup %1611  ;;  %1631 = vpow2.f32 %v1375_v4  ;;  %v2388_v4 = vadd.f32 %v2253_v35, %v674_v50  ;;  %v941_v5 = vmul.f32 %v1610_v37, %v2263_v44  ;;  %v673_v50 = vmul.f32 %v2251_v33, %v2333_v6 }
 0x180   : > { %v1614_v53 = vpop.eup %1613  ;;  %1633 = vpow2.f32 %v1391_v11  ;;  %v925_v11 = vmul.f32 %v1608_v31, %v2260_v43  ;;  %v924_v44 = vmul.f32 %v1612_v41, %v2266_v45  ;;  %v675_v6 = vmul.f32 %v2251_v33, %v2355_v28 }
 0x181   : > { %v1616_v55 = vpop.eup %1615  ;;  %1635 = vpow2.f32 %v1374_v32  ;;  %1054 = vrot.lane.b32.xlu1 %v941_v5, %s1939_s24  ;;  %973 = vst.msk [vmem:[%s2396_s26 + $0x88] sm:$0xff] %vm328_vm1, %v941_v5  ;;  %v940_v20 = vmul.f32 %v1614_v53, %v2269_v46  ;;  %v1381_v23 = vmul.f32 -1.442695, %v2388_v4  ;;  %v691_v28 = vmul.f32 %v2251_v33, %v2357_v30 }
 0x182   : > { %v1618_v57 = vpop.eup %1617  ;;  %1637 = vpow2.f32 %v1390_v38  ;;  %v927_v15 = vmul.f32 %v1616_v55, %v2280_v59  ;;  %1022 = vrot.lane.b32.xlu0 %v925_v11, %s1939_s24  ;;  %957 = vst.msk [vmem:[%s2396_s26 + $0x8] sm:$0xff] %vm328_vm1, %v925_v11  ;;  %956 = vst.msk [vmem:[%s2396_s26] sm:$0xff] %vm328_vm1, %v924_v44  ;;  %v689_v55 = vmul.f32 %v2251_v33, %v2335_v7 }
 0x183   : > { %v1620_v2 = vpop.eup %1619  ;;  %1639 = vpow2.f32 %v1377_v42  ;;  %v943_v45 = vmul.f32 %v1618_v57, %v2283_v60  ;;  %972 = vst.msk [vmem:[%s2396_s26 + $0x80] sm:$0xff] %vm328_vm1, %v940_v20 }
 0x184   : > { %v1622_v8 = vpop.eup %1621  ;;  %1641 = vpow2.f32 %v1393_v48  ;;  %959 = vst.msk [vmem:[%s2396_s26 + $0x18] sm:$0xff] %vm328_vm1, %v927_v15  ;;  %v926_v46 = vmul.f32 %v1620_v2, %v2286_v61 }
 0x185   : > { %v1624_v13 = vpop.eup %1623  ;;  %1643 = vpow2.f32 %v1376_v52  ;;  %v942_v59 = vmul.f32 %v1622_v8, %v2289_v62  ;;  %1026 = vrot.lane.b32.xlu1 %v927_v15, %s1939_s24  ;;  %975 = vst.msk [vmem:[%s2396_s26 + $0x98] sm:$0xff] %vm328_vm1, %v943_v45  ;;  %v2466_v8 = vadd.f32 %v2253_v35, %v673_v50  ;;  %v2477_v15 = vadd.f32 %v2253_v35, %v676_v1 }
 0x186   : > { %v1626_v43 = vpop.eup %1625  ;;  %1645 = vpow2.f32 %v1392_v63  ;;  %v2418_v29 = vmul.f32 %v1624_v13, %v2298_v9  ;;  %1020 = vrot.lane.b32.xlu0 %v924_v44, %s1939_s24  ;;  %958 = vst.msk [vmem:[%s2396_s26 + $0x10] sm:$0xff] %vm328_vm1, %v926_v46  ;;  %v2472_v13 = vadd.f32 %v2253_v35, %v689_v55 }
 0x187   : > { %v1628_v21 = vpop.eup %1627  ;;  %1647 = vpow2.f32 %v1379_v3  ;;  %974 = vst.msk [vmem:[%s2396_s26 + $0x90] sm:$0xff] %vm328_vm1, %v942_v59  ;;  %v2429_v60 = vmul.f32 %v1626_v43, %v2303_v12  ;;  %v2460_v3 = vadd.f32 %v2253_v35, %v690_v40  ;;  %v1380_v30 = vmul.f32 -1.442695, %v2466_v8 }
 0x188   : > { %v1630_v26 = vpop.eup %1629  ;;  %1649 = vpow2.f32 %v1395_v10  ;;  %v2421_v31 = vmul.f32 %v1628_v21, %v2307_v16  ;;  %961 = vst.msk [vmem:[%s2396_s26 + $0x28] sm:$0xff] %vm328_vm1, %v2418_v29 }
 0x189   : > { %v1632_v32 = vpop.eup %1631  ;;  %1651 = vpow2.f32 %v1378_v14  ;;  %v2432_v61 = vmul.f32 %v1630_v26, %v2310_v17  ;;  %977 = vst.msk [vmem:[%s2396_s26 + $0xa8] sm:$0xff] %vm328_vm1, %v2429_v60  ;;  %1058 = vrot.lane.b32.xlu1 %v943_v45, %s1939_s24  ;;  %v2493_v26 = vadd.f32 %v2253_v35, %v691_v28 }
 0x18a   : > { %v1634_v62 = vpop.eup %1633  ;;  %v835_v9 = vadd.f32 1.0, %v1632_v32  ;;  %1653 = vpow2.f32 %v1394_v19  ;;  %960 = vst.msk [vmem:[%s2396_s26 + $0x20] sm:$0xff] %vm328_vm1, %v2421_v31  ;;  %1052 = vrot.lane.b32.xlu0 %v940_v20, %s1939_s24  ;;  %v1397_v19 = vmul.f32 -1.442695, %v2460_v3  ;;  %v2481_v20 = vadd.f32 %v2253_v35, %v675_v6 }
 0x18b   : > { %v1636_v16 = vpop.eup %1635  ;;  %v851_v36 = vadd.f32 1.0, %v1634_v62  ;;  %1655 = vpow2.f32 %v1381_v23  ;;  %976 = vst.msk [vmem:[%s2396_s26 + $0xa0] sm:$0xff] %vm328_vm1, %v2432_v61  ;;  %v2487_v23 = vadd.f32 %v2253_v35, %v692_v24  ;;  %v1383_v32 = vmul.f32 -1.442695, %v2477_v15 }
 0x18c   : > { %v1638_v12 = vpop.eup %1637  ;;  %1657 = vrcp.f32 %v835_v9  ;;  %v834_v17 = vadd.f32 1.0, %v1636_v16 }
 0x18d   : > { %v1640_v37 = vpop.eup %1639  ;;  %1659 = vrcp.f32 %v851_v36  ;;  %v850_v38 = vadd.f32 1.0, %v1638_v12  ;;  %1024 = vrot.lane.b32.xlu1 %v926_v46, %s1939_s24  ;;  %v1399_v16 = vmul.f32 -1.442695, %v2487_v23 }
 0x18e   : > { %v1642_v41 = vpop.eup %1641  ;;  %1661 = vrcp.f32 %v834_v17  ;;  %v837_v42 = vadd.f32 1.0, %v1640_v37  ;;  %1056 = vrot.lane.b32.xlu0 %v942_v59, %s1939_s24  ;;  %v1396_v59 = vmul.f32 -1.442695, %v2472_v13 }
 0x18f   : > { %v1644_v53 = vpop.eup %1643  ;;  %1663 = vrcp.f32 %v850_v38  ;;  %v853_v48 = vadd.f32 1.0, %v1642_v41 }
 0x190   : > { %v1646_v52 = vpop.eup %1645  ;;  %1665 = vrcp.f32 %v837_v42  ;;  %v836_v57 = vadd.f32 1.0, %v1644_v53 }
 0x191   : > { %v1648_v63 = vpop.eup %1647  ;;  %1667 = vrcp.f32 %v853_v48  ;;  %v852_v2 = vadd.f32 1.0, %v1646_v52  ;;  %1030 = vrot.lane.b32.xlu1 %v2418_v29, %s1939_s24 }
 0x192   : > { %v1650_v5 = vpop.eup %1649  ;;  %1669 = vrcp.f32 %v836_v57  ;;  %v839_v7 = vadd.f32 1.0, %v1648_v63  ;;  %1028 = vrot.lane.b32.xlu0 %v2421_v31, %s1939_s24  ;;  %v1382_v31 = vmul.f32 -1.442695, %v2481_v20 }
 0x193   : > { %v1652_v10 = vpop.eup %1651  ;;  %1671 = vrcp.f32 %v852_v2  ;;  %v855_v11 = vadd.f32 1.0, %v1650_v5 }
 0x194   : > { %v1654_v14 = vpop.eup %1653  ;;  %1673 = vrcp.f32 %v839_v7  ;;  %v838_v44 = vadd.f32 1.0, %v1652_v10 }
 0x195   : > { %v1656_v43 = vpop.eup %1655  ;;  %1675 = vrcp.f32 %v855_v11  ;;  %v854_v25 = vadd.f32 1.0, %v1654_v14  ;;  %1062 = vrot.lane.b32.xlu1 %v2429_v60, %s1939_s24  ;;  %v1398_v60 = vmul.f32 -1.442695, %v2493_v26 }
 0x196   : > { %v1658_v21 = vpop.eup %1657  ;;  %1677 = vrcp.f32 %v838_v44  ;;  %v841_v33 = vadd.f32 1.0, %v1656_v43  ;;  %1060 = vrot.lane.b32.xlu0 %v2432_v61, %s1939_s24 }
 0x197   : > { %v1660_v45 = vpop.eup %1659  ;;  %1679 = vrcp.f32 %v854_v25  ;;  %v931_v46 = vmul.f32 %v1658_v21, %v2319_v47 }
 0x198   : > { %v1662_v29 = vpop.eup %1661  ;;  %1681 = vrcp.f32 %v841_v33  ;;  %v947_v62 = vmul.f32 %v1660_v45, %v2322_v51 }
 0x199   : > { %v1664_v9 = vpop.eup %1663  ;;  %1683 = vpow2.f32 %v1397_v19  ;;  %963 = vst.msk [vmem:[%s2396_s26 + $0x38] sm:$0xff] %vm328_vm1, %v931_v46  ;;  %v930_v35 = vmul.f32 %v1662_v29, %v2326_v58  ;;  %1034 = vrot.lane.b32.xlu1 %v931_v46, %s1939_s24 }
 0x19a   : > { %v1666_v47 = vpop.eup %1665  ;;  %1685 = vpow2.f32 %v1380_v30  ;;  %979 = vst.msk [vmem:[%s2396_s26 + $0xb8] sm:$0xff] %vm328_vm1, %v947_v62  ;;  %v946_v51 = vmul.f32 %v1664_v9, %v2340_v18 }
 0x19b   : > { %v1668_v36 = vpop.eup %1667  ;;  %1687 = vpow2.f32 %v1396_v59  ;;  %962 = vst.msk [vmem:[%s2396_s26 + $0x30] sm:$0xff] %vm328_vm1, %v930_v35  ;;  %v933_v58 = vmul.f32 %v1666_v47, %v2344_v22  ;;  %1032 = vrot.lane.b32.xlu0 %v930_v35, %s1939_s24 }
 0x19c   : > { %v1670_v12 = vpop.eup %1669  ;;  %1689 = vpow2.f32 %v1383_v32  ;;  %978 = vst.msk [vmem:[%s2396_s26 + $0xb0] sm:$0xff] %vm328_vm1, %v946_v51  ;;  %v949_v61 = vmul.f32 %v1668_v36, %v2352_v27 }
 0x19d   : > { %v1672_v17 = vpop.eup %1671  ;;  %1691 = vpow2.f32 %v1382_v31  ;;  %965 = vst.msk [vmem:[%s2396_s26 + $0x48] sm:$0xff] %vm328_vm1, %v933_v58  ;;  %v932_v18 = vmul.f32 %v1670_v12, %v2361_v34  ;;  %1066 = vrot.lane.b32.xlu1 %v947_v62, %s1939_s24 }
 0x19e   : > { %v1674_v37 = vpop.eup %1673  ;;  %1693 = vpow2.f32 %v1399_v16  ;;  %981 = vst.msk [vmem:[%s2396_s26 + $0xc8] sm:$0xff] %vm328_vm1, %v949_v61  ;;  %v948_v22 = vmul.f32 %v1672_v17, %v2366_v39 }
 0x19f   : > { %v1676_v27 = vpop.eup %1675  ;;  %1695 = vpow2.f32 %v1398_v60  ;;  %964 = vst.msk [vmem:[%s2396_s26 + $0x40] sm:$0xff] %vm328_vm1, %v932_v18  ;;  %v935_v38 = vmul.f32 %v1674_v37, %v2371_v49  ;;  %1064 = vrot.lane.b32.xlu0 %v946_v51, %s1939_s24 }
 0x1a0   : > { %v1678_v40 = vpop.eup %1677  ;;  %980 = vst.msk [vmem:[%s2396_s26 + $0xc0] sm:$0xff] %vm328_vm1, %v948_v22  ;;  %v951_v34 = vmul.f32 %v1676_v27, %v2376_v54 }
 0x1a1   : > { %v1680_v41 = vpop.eup %1679  ;;  %967 = vst.msk [vmem:[%s2396_s26 + $0x58] sm:$0xff] %vm328_vm1, %v935_v38  ;;  %v934_v39 = vmul.f32 %v1678_v40, %v2380_v56  ;;  %1038 = vrot.lane.b32.xlu1 %v933_v58, %s1939_s24 }
 0x1a2   : > { %v1682_v42 = vpop.eup %1681  ;;  %983 = vst.msk [vmem:[%s2396_s26 + $0xd8] sm:$0xff] %vm328_vm1, %v951_v34  ;;  %v950_v49 = vmul.f32 %v1680_v41, %v2384_v0 }
 0x1a3   : > { %v1684_v50 = vpop.eup %1683  ;;  %966 = vst.msk [vmem:[%s2396_s26 + $0x50] sm:$0xff] %vm328_vm1, %v934_v39  ;;  %v937_v54 = vmul.f32 %v1682_v42, %v2388_v4  ;;  %1036 = vrot.lane.b32.xlu0 %v932_v18, %s1939_s24 }
 0x1a4   : > { %v1686_v53 = vpop.eup %1685  ;;  %v857_v48 = vadd.f32 1.0, %v1684_v50  ;;  %982 = vst.msk [vmem:[%s2396_s26 + $0xd0] sm:$0xff] %vm328_vm1, %v950_v49 }
 0x1a5   : > { %v1688_v55 = vpop.eup %1687  ;;  %v840_v52 = vadd.f32 1.0, %v1686_v53  ;;  %969 = vst.msk [vmem:[%s2396_s26 + $0x68] sm:$0xff] %vm328_vm1, %v937_v54  ;;  %1070 = vrot.lane.b32.xlu1 %v949_v61, %s1939_s24 }
 0x1a6   : > { %v1690_v56 = vpop.eup %1689  ;;  %1697 = vrcp.f32 %v857_v48  ;;  %v856_v57 = vadd.f32 1.0, %v1688_v55 }
 0x1a7   : > { %v1692_v0 = vpop.eup %1691  ;;  %1699 = vrcp.f32 %v840_v52  ;;  %v843_v1 = vadd.f32 1.0, %v1690_v56  ;;  %1068 = vrot.lane.b32.xlu0 %v948_v22, %s1939_s24 }
 0x1a8   : > { %v1694_v63 = vpop.eup %1693  ;;  %1701 = vrcp.f32 %v856_v57  ;;  %v842_v4 = vadd.f32 1.0, %v1692_v0 }
 0x1a9   : > { %v1696_v2 = vpop.eup %1695  ;;  %1703 = vrcp.f32 %v843_v1  ;;  %v859_v6 = vadd.f32 1.0, %v1694_v63  ;;  %1042 = vrot.lane.b32.xlu1 %v935_v38, %s1939_s24 }
 0x1aa   : > { %1705 = vrcp.f32 %v842_v4  ;;  %v858_v5 = vadd.f32 1.0, %v1696_v2 }
 0x1ab   : > { %1707 = vrcp.f32 %v859_v6  ;;  %1040 = vrot.lane.b32.xlu0 %v934_v39, %s1939_s24 }
 0x1ac   : > { %1709 = vrcp.f32 %v858_v5 }
 0x1ad   : > { %1074 = vrot.lane.b32.xlu1 %v951_v34, %s1939_s24 }
 0x1af   : > { %1072 = vrot.lane.b32.xlu0 %v950_v49, %s1939_s24 }
 0x1b0   : > { %v1698_v7 = vpop.eup %1697 }
 0x1b1   : > { %v1700_v24 = vpop.eup %1699  ;;  %v953_v10 = vmul.f32 %v1698_v7, %v2460_v3  ;;  %1046 = vrot.lane.b32.xlu1 %v937_v54, %s1939_s24 }
 0x1b2   : > { %v1702_v11 = vpop.eup %1701  ;;  %v936_v28 = vmul.f32 %v1700_v24, %v2466_v8 }
 0x1b3   : > { %v1704_v14 = vpop.eup %1703  ;;  %985 = vst.msk [vmem:[%s2396_s26 + $0xe8] sm:$0xff] %vm328_vm1, %v953_v10  ;;  %v952_v44 = vmul.f32 %v1702_v11, %v2472_v13 }
 0x1b4   : > { %v1706_v43 = vpop.eup %1705  ;;  %968 = vst.msk [vmem:[%s2396_s26 + $0x60] sm:$0xff] %vm328_vm1, %v936_v28  ;;  %v939_v3 = vmul.f32 %v1704_v14, %v2477_v15  ;;  %1044 = vrot.lane.b32.xlu0 %v936_v28, %s1939_s24 }
 0x1b5   : > { %v1708_v25 = vpop.eup %1707  ;;  %984 = vst.msk [vmem:[%s2396_s26 + $0xe0] sm:$0xff] %vm328_vm1, %v952_v44  ;;  %v938_v8 = vmul.f32 %v1706_v43, %v2481_v20  ;;  %1078 = vrot.lane.b32.xlu1 %v953_v10, %s1939_s24 }
 0x1b6   : > { %v1710_v19 = vpop.eup %1709  ;;  %971 = vst.msk [vmem:[%s2396_s26 + $0x78] sm:$0xff] %vm328_vm1, %v939_v3  ;;  %v955_v13 = vmul.f32 %v1708_v25, %v2487_v23 }
 0x1b7   : > { %970 = vst.msk [vmem:[%s2396_s26 + $0x70] sm:$0xff] %vm328_vm1, %v938_v8  ;;  %v954_v15 = vmul.f32 %v1710_v19, %v2493_v26 }
 0x1b8   : > { %987 = vst.msk [vmem:[%s2396_s26 + $0xf8] sm:$0xff] %vm328_vm1, %v955_v13  ;;  %1076 = vrot.lane.b32.xlu0 %v952_v44, %s1939_s24 }
 0x1b9   : > { %986 = vst.msk [vmem:[%s2396_s26 + $0xf0] sm:$0xff] %vm328_vm1, %v954_v15 }
 0x1ba   : > { %1838 = shalt.err (!%p1835_p13)
}
 0x1bb   : > { %s1839_s27 = scalar_lea.hbm %s2580_s23, 4096  ;;  %s1843_s30 = scalar_lea.hbm %s2747_s4, 8192 }
 0x1bc   : > { %p1840_p0 = scmp.ne.s32.totalorder %s2580_s23, %s1839_s27  ;;  %p1844_p9 = scmp.lt.u32.totalorder %s2580_s23, %s2747_s4 }
 0x1bd   : > { %p1845_p12 = scmp.lt.u32.totalorder %s1843_s30, %s1839_s27  ;;  %p1847_p1 = scmp.lt.u32.totalorder %s1839_s27, %s2580_s23 }
 0x1be   : > { %p1841_p5 = pnand %p1840_p0, %p2118_p6 }
 0x1bf   : > { %p1846_p2 = por %p1845_p12, %p1844_p9 }
 0x1c0   : > { %p1842_p11 = pneg %p1841_p5 }
 0x1c1   : > { %p1848_p4 = por %p1847_p1, %p1846_p2 }
 0x1c3   : > { %p1849_p8 = pnand %p1848_p4, %p1842_p11 }
 0x1c5   : > { %1852 = shalt.err (!%p1849_p8)
}
 0x1c6   : > { %s1941_s7 = smov 128   ;;  %s1942_s13 = smov 8   ;;  %1050 = vrot.lane.b32.xlu1 %v939_v3, %s1939_s24  ;;  %1048 = vrot.lane.b32.xlu0 %v938_v8, %s1939_s24 }
 0x1c7   : > { %1510 = dma.vmem_to_hbm [thread:$0]  (%p2118_p6), %s2582_s11, 4096, %s2580_s23, %s1149_s29, %s1941_s7, %s1941_s7, %s1942_s13  }
 0x1c8   : > { %s2622_s28 = scalar_lea.vmem [#allocation11], %s2169_s15  ;;  %s2690_s23 = scalar_lea.hbm %s2748_s5, %s1409_s9 }
 0x1c9   : > { %s1183_s15 = sshll.u32 %s2622_s28, 4  ;;  %s1154_s29 = scalar_lea.sflag [#allocation12], %s2166_s6  ;;  %s2692_s15 = int_to_ptr.vmem [resolvable:$true] %s1183_s15 }
 0x1ca   : > { %1082 = vrot.lane.b32.xlu1 %v955_v13, %s1939_s24  ;;  %1080 = vrot.lane.b32.xlu0 %v954_v15, %s1939_s24  ;;  %s1853_s27 = scalar_lea.vmem %s2692_s15, 4096  ;;  %s1943_s22 = smov [#allocation11]  }
 0x1cb   : > { %p1854_p3 = scmp.ne.s32.totalorder %s2692_s15, %s1853_s27  ;;  %s1857_s8 = sshll.u32 %s1943_s22, 4  ;;  %s1858_s8 = int_to_ptr.vmem [resolvable:$false] %s1857_s8 }
 0x1cc   : > { %s1859_s9 = scalar_lea.vmem %s1858_s8, 8192  ;;  %p1860_p13 = scmp.lt.s32.totalorder %s2692_s15, %s1858_s8 }
 0x1cd   : > { %p1855_p7 = pnand %p1854_p3, %p2118_p6  ;;  %p1861_p0 = scmp.lt.s32.totalorder %s1859_s9, %s1853_s27 }
 0x1cf   : > { %p1856_p10 = pneg %p1855_p7  ;;  %p1862_p5 = por %p1861_p0, %p1860_p13 }
 0x1d1   : > { %p1863_p11 = pnand %p1862_p5, %p1856_p10 }
 0x1f3   : > { %v1055_v20 = vpop.permute.xlu1 %1054 }
 0x1f4   : > { %1133 = vst.msk [vmem:[%s2622_s28 + $0x88] sm:$0xff] %vm328_vm1, %v1055_v20  ;;  %v1023_v21 = vpop.permute.xlu0 %1022 }
 0x1f5   : > { %1117 = vst.msk [vmem:[%s2622_s28 + $0x8] sm:$0xff] %vm328_vm1, %v1023_v21 }
 0x1f7   : > { %v1027_v33 = vpop.permute.xlu1 %1026 }
 0x1f8   : > { %v1021_v30 = vpop.permute.xlu0 %1020  ;;  %1119 = vst.msk [vmem:[%s2622_s28 + $0x18] sm:$0xff] %vm328_vm1, %v1027_v33 }
 0x1f9   : > { %1116 = vst.msk [vmem:[%s2622_s28] sm:$0xff] %vm328_vm1, %v1021_v30 }
 0x1fb   : > { %v1059_v23 = vpop.permute.xlu1 %1058 }
 0x1fc   : > { %v1053_v45 = vpop.permute.xlu0 %1052  ;;  %1135 = vst.msk [vmem:[%s2622_s28 + $0x98] sm:$0xff] %vm328_vm1, %v1059_v23 }
 0x1fd   : > { %1132 = vst.msk [vmem:[%s2622_s28 + $0x80] sm:$0xff] %vm328_vm1, %v1053_v45 }
 0x1ff   : > { %v1025_v59 = vpop.permute.xlu1 %1024 }
 0x200   : > { %v1057_v26 = vpop.permute.xlu0 %1056  ;;  %1118 = vst.msk [vmem:[%s2622_s28 + $0x10] sm:$0xff] %vm328_vm1, %v1025_v59 }
 0x201   : > { %1134 = vst.msk [vmem:[%s2622_s28 + $0x90] sm:$0xff] %vm328_vm1, %v1057_v26 }
 0x203   : > { %v1031_v46 = vpop.permute.xlu1 %1030 }
 0x204   : > { %1121 = vst.msk [vmem:[%s2622_s28 + $0x28] sm:$0xff] %vm328_vm1, %v1031_v46  ;;  %v1029_v29 = vpop.permute.xlu0 %1028 }
 0x205   : > { %1120 = vst.msk [vmem:[%s2622_s28 + $0x20] sm:$0xff] %vm328_vm1, %v1029_v29 }
 0x207   : > { %v1063_v32 = vpop.permute.xlu1 %1062 }
 0x208   : > { %1137 = vst.msk [vmem:[%s2622_s28 + $0xa8] sm:$0xff] %vm328_vm1, %v1063_v32  ;;  %v1061_v62 = vpop.permute.xlu0 %1060 }
 0x209   : > { %1136 = vst.msk [vmem:[%s2622_s28 + $0xa0] sm:$0xff] %vm328_vm1, %v1061_v62 }
 0x20b   : > { %v1035_v9 = vpop.permute.xlu1 %1034 }
 0x20c   : > { %1123 = vst.msk [vmem:[%s2622_s28 + $0x38] sm:$0xff] %vm328_vm1, %v1035_v9 }
 0x20d   : > { %v1033_v31 = vpop.permute.xlu0 %1032 }
 0x20e   : > { %1122 = vst.msk [vmem:[%s2622_s28 + $0x30] sm:$0xff] %vm328_vm1, %v1033_v31 }
 0x20f   : > { %v1067_v35 = vpop.permute.xlu1 %1066 }
 0x210   : > { %1139 = vst.msk [vmem:[%s2622_s28 + $0xb8] sm:$0xff] %vm328_vm1, %v1067_v35 }
 0x211   : > { %v1065_v47 = vpop.permute.xlu0 %1064 }
 0x212   : > { %1138 = vst.msk [vmem:[%s2622_s28 + $0xb0] sm:$0xff] %vm328_vm1, %v1065_v47 }
 0x213   : > { %v1039_v16 = vpop.permute.xlu1 %1038 }
 0x214   : > { %1125 = vst.msk [vmem:[%s2622_s28 + $0x48] sm:$0xff] %vm328_vm1, %v1039_v16 }
 0x215   : > { %v1037_v51 = vpop.permute.xlu0 %1036 }
 0x216   : > { %1124 = vst.msk [vmem:[%s2622_s28 + $0x40] sm:$0xff] %vm328_vm1, %v1037_v51 }
 0x217   : > { %v1071_v36 = vpop.permute.xlu1 %1070 }
 0x218   : > { %1141 = vst.msk [vmem:[%s2622_s28 + $0xc8] sm:$0xff] %vm328_vm1, %v1071_v36 }
 0x219   : > { %v1069_v60 = vpop.permute.xlu0 %1068 }
 0x21a   : > { %1140 = vst.msk [vmem:[%s2622_s28 + $0xc0] sm:$0xff] %vm328_vm1, %v1069_v60 }
 0x21b   : > { %v1043_v58 = vpop.permute.xlu1 %1042 }
 0x21c   : > { %1127 = vst.msk [vmem:[%s2622_s28 + $0x58] sm:$0xff] %vm328_vm1, %v1043_v58 }
 0x21d   : > { %v1041_v12 = vpop.permute.xlu0 %1040 }
 0x21e   : > { %1126 = vst.msk [vmem:[%s2622_s28 + $0x50] sm:$0xff] %vm328_vm1, %v1041_v12 }
 0x21f   : > { %v1075_v61 = vpop.permute.xlu1 %1074 }
 0x220   : > { %1143 = vst.msk [vmem:[%s2622_s28 + $0xd8] sm:$0xff] %vm328_vm1, %v1075_v61 }
 0x221   : > { %v1073_v17 = vpop.permute.xlu0 %1072 }
 0x222   : > { %1142 = vst.msk [vmem:[%s2622_s28 + $0xd0] sm:$0xff] %vm328_vm1, %v1073_v17 }
 0x223   : > { %v1047_v18 = vpop.permute.xlu1 %1046 }
 0x224   : > { %1129 = vst.msk [vmem:[%s2622_s28 + $0x68] sm:$0xff] %vm328_vm1, %v1047_v18 }
 0x226   : > { %v1045_v37 = vpop.permute.xlu0 %1044 }
 0x227   : > { %1128 = vst.msk [vmem:[%s2622_s28 + $0x60] sm:$0xff] %vm328_vm1, %v1045_v37  ;;  %v1079_v22 = vpop.permute.xlu1 %1078 }
 0x228   : > { %1145 = vst.msk [vmem:[%s2622_s28 + $0xe8] sm:$0xff] %vm328_vm1, %v1079_v22 }
 0x22a   : > { %v1077_v27 = vpop.permute.xlu0 %1076 }
 0x22b   : > { %1144 = vst.msk [vmem:[%s2622_s28 + $0xe0] sm:$0xff] %vm328_vm1, %v1077_v27 }
 0x238   : > { %v1051_v38 = vpop.permute.xlu1 %1050  ;;  %v1049_v40 = vpop.permute.xlu0 %1048 }
 0x239   : > { %1131 = vst.msk [vmem:[%s2622_s28 + $0x78] sm:$0xff] %vm328_vm1, %v1051_v38  ;;  %1130 = vst.msk [vmem:[%s2622_s28 + $0x70] sm:$0xff] %vm328_vm1, %v1049_v40 }
 0x23c   : > { %v1083_v34 = vpop.permute.xlu1 %1082  ;;  %v1081_v41 = vpop.permute.xlu0 %1080 }
 0x23d   : > { %1147 = vst.msk [vmem:[%s2622_s28 + $0xf8] sm:$0xff] %vm328_vm1, %v1083_v34  ;;  %1146 = vst.msk [vmem:[%s2622_s28 + $0xf0] sm:$0xff] %vm328_vm1, %v1081_v41 }
 0x23e   : > { %1866 = shalt.err (!%p1863_p11)
}
 0x23f   : > { %s1867_s26 = scalar_lea.hbm %s2690_s23, 4096  ;;  %s1871_s10 = scalar_lea.hbm %s2748_s5, 8192 }
 0x240   : > { %p1868_p9 = scmp.ne.s32.totalorder %s2690_s23, %s1867_s26  ;;  %p1872_p1 = scmp.lt.u32.totalorder %s2690_s23, %s2748_s5 }
 0x241   : > { %p1873_p4 = scmp.lt.u32.totalorder %s1871_s10, %s1867_s26  ;;  %p1875_p3 = scmp.lt.u32.totalorder %s1867_s26, %s2690_s23 }
 0x242   : > { %p1869_p12 = pnand %p1868_p9, %p2118_p6 }
 0x243   : > { %p1874_p8 = por %p1873_p4, %p1872_p1 }
 0x244   : > { %p1870_p2 = pneg %p1869_p12 }
 0x245   : > { %p1876_p7 = por %p1875_p3, %p1874_p8 }
 0x247   : > { %p1877_p10 = pnand %p1876_p7, %p1870_p2 }
 0x249   : > { %1880 = shalt.err (!%p1877_p10)
}
 0x24a   : > { %1511 = dma.vmem_to_hbm [thread:$0]  (%p2118_p6), %s2692_s15, 4096, %s2690_s23, %s1154_s29, %s1941_s7, %s1941_s7, %s1942_s13  }
 0x24b PF: > { %s1198_s11 = sand.u32 1, %s1919_s18   ;;  %p2766_p13 = scmp.ne.s32.totalorder %s2753_s25, 0 }
 0x24c   : > { %p2767_p0 = scmp.ge.s32.totalorder %s1931_s21, 2  ;;  %s1199_s27 = scalar_lea.sflag [#allocation4], %s1198_s11 }
 0x24e   : > { %p1529_p5 = pnand %p2767_p0, %p2766_p13 }
 0x250   : > { %1910 = dma.done.wait (!%p1529_p5), %s1199_s27, 4096  }
 0x251   : > { %1912 = vsyncadd (!%p1529_p5), %s1199_s27, 4294963200  ;;  %s1208_s17 = scalar_lea.sflag [#allocation12], %s1198_s11 }
 0x252   : > { %1914 = dma.done.wait (!%p1529_p5), %s1208_s17, 4096  }
 0x253   : > { %1916 = vsyncadd (!%p1529_p5), %s1208_s17, 4294963200  ;;  %p24_p6 = scmp.ge.s32.totalorder %s2104_s14, 4   ;;  %s2768_s18 = smov %s1923_s19 }
 0x254   : > { %s2769_s19 = smov %s1927_s20  ;;  %s2770_s20 = smov %s2114_s16 }
 0x255   : > { %s2771_s21 = smov %s2104_s14  ;;  %26 = sbr.rel (!%p24_p6) target bundleno = 9 (0x9), region = 110 }
 0x25c   :  { %1213 = vsyncpa [#allocation3], 1 }
 0x25d   :  { %1215 = vsyncpa [#allocation3 + $0x1], 1 }
 0x25e   :  { %1216 = vsyncpa [#allocation6], 1 }
 0x25f   :  { %1217 = vsyncpa [#allocation9], 1 }
 0x260   :  { %1218 = vsyncpa [#allocation4], 1 }
 0x261   :  { %1220 = vsyncpa [#allocation4 + $0x1], 1 }
 0x262   :  { %1221 = vsyncpa [#allocation12], 1 }
 0x263   :  { %1223 = vsyncpa [#allocation12 + $0x1], 1 }

</bundles_post_ra>
